<compile_context>
chip_gen: v7x
topology: tpu7x:2x2x1
jax: 0.10.0
libtpu: 0.0.40
codegen_flags: <defaults>
</compile_context>

<pallas_src>
import functools

import jax
import jax.numpy as jnp
from jax.experimental import pallas as pl
from jax.experimental.pallas import tpu as pltpu


def _round_up(x, m):
    return (x + m - 1) // m * m


def bilinear_kernel(x_ref, y_ref, w_ref, b_ref, o_ref, *, dx):
    # x_ref: (TM, Dx) f32   y_ref: (TM, Dy) f32
    # w_ref: (Dx*Dy, O_pad) bf16  (VMEM-resident across the row grid)
    # b_ref: (1, O_pad) f32       o_ref: (TM, O_pad) f32
    x = x_ref[...]
    y = y_ref[...]
    # z[b, i*Dy + j] = x[b, i] * y[b, j]; built by lane-concatenating Dx rank-1 pieces
    # (static 1-lane slices + broadcast multiplies) to avoid an in-kernel lane reshape.
    pieces = [x[:, i:i + 1] * y for i in range(dx)]
    z = jnp.concatenate(pieces, axis=1)                       # (TM, Dx*Dy) f32
    z = z.astype(w_ref.dtype)                                 # bf16 MXU operands
    out = jnp.dot(z, w_ref[...], preferred_element_type=jnp.float32)
    out = out + b_ref[...]                                    # f32 bias add
    o_ref[...] = out.astype(o_ref.dtype)


def bilinear_fusion_forward(x, y, w, b, *, block_rows=128, compute_dtype=jnp.bfloat16):
    """Bilinear_Fusion_Layer forward.

    x: (batch, Dx), y: (batch, Dy), w: (O, Dx, Dy), b: (O,)  ->  (batch, O)
    """
    batch, dx = x.shape
    _, dy = y.shape
    o_dim = w.shape[0]
    assert w.shape == (o_dim, dx, dy) and b.shape == (o_dim,)

    # ---- host-side layout plumbing: lane-dense / tile-friendly padding ----
    o_pad = _round_up(o_dim, 128)                       # lane-dense output stores
    tm = max(8, min(block_rows, _round_up(batch, 8)))   # row tile (multiple of 8 sublanes)
    rows_pad = _round_up(batch, tm)

    x_p = jnp.zeros((rows_pad, dx), jnp.float32).at[:batch].set(x.astype(jnp.float32))
    y_p = jnp.zeros((rows_pad, dy), jnp.float32).at[:batch].set(y.astype(jnp.float32))

    # W (O, Dx, Dy) -> (Dx*Dy, O_pad) so that row i*Dy+j matches z[b, i*Dy+j] = x[b,i]*y[b,j].
    w_f = jnp.transpose(w, (1, 2, 0)).reshape(dx * dy, o_dim)
    w_f = jnp.zeros((dx * dy, o_pad), jnp.float32).at[:, :o_dim].set(w_f)
    w_f = w_f.astype(compute_dtype)
    b_p = jnp.zeros((1, o_pad), jnp.float32).at[0, :o_dim].set(b.astype(jnp.float32))

    out = pl.pallas_call(
        functools.partial(bilinear_kernel, dx=dx),
        out_shape=jax.ShapeDtypeStruct((rows_pad, o_pad), jnp.float32),
        grid_spec=pl.GridSpec(
            grid=(rows_pad // tm,),
            in_specs=[
                pl.BlockSpec((tm, dx), lambda m: (m, 0)),          # stream X row tiles
                pl.BlockSpec((tm, dy), lambda m: (m, 0)),          # stream Y row tiles
                pl.BlockSpec((dx * dy, o_pad), lambda m: (0, 0)),  # weights VMEM-resident
                pl.BlockSpec((1, o_pad), lambda m: (0, 0)),        # bias VMEM-resident
            ],
            out_specs=pl.BlockSpec((tm, o_pad), lambda m: (m, 0)),
        ),
        compiler_params=pltpu.CompilerParams(
            dimension_semantics=("parallel",),  # row tiles independent -> sharded across TCs on v7x
        ),
    )(x_p, y_p, w_f, b_p)

    return out[:batch, :o_dim]


if __name__ == "__main__":
    # Small shapes consistent with the module: X:(batch,Dx), Y:(batch,Dy), W:(O,Dx,Dy), b:(O,)
    batch, dim_x, dim_y, out_dim = 50, 16, 32, 100

    key = jax.random.PRNGKey(0)
    kx, ky, kw, kb = jax.random.split(key, 4)
    X = jax.random.normal(kx, (batch, dim_x), jnp.float32)
    Y = jax.random.normal(ky, (batch, dim_y), jnp.float32)
    bound = 1.0 / (dim_x ** 0.5)
    W = jax.random.uniform(kw, (out_dim, dim_x, dim_y), jnp.float32, minval=-bound, maxval=bound)
    b = jax.random.uniform(kb, (out_dim,), jnp.float32, minval=-bound, maxval=bound)

    # block_rows=32 with batch=50 -> rows padded to 64, grid=(2,): exercises tiling + padding paths.
    out = bilinear_fusion_forward(X, Y, W, b, block_rows=32)
    out = jax.block_until_ready(out)

    # Reference that mirrors the kernel numerics (bf16 matmul operands, f32 accumulation).
    z = (X[:, :, None] * Y[:, None, :]).reshape(batch, dim_x * dim_y)
    zq = z.astype(jnp.bfloat16).astype(jnp.float32)
    wq = jnp.transpose(W, (1, 2, 0)).reshape(dim_x * dim_y, out_dim)
    wq = wq.astype(jnp.bfloat16).astype(jnp.float32)
    ref = zq @ wq + b[None, :]

    # Full-precision reference of the module semantics (sanity check, looser tolerance for bf16).
    ref_f32 = jnp.einsum('bi,oij,bj->bo', X, W, Y) + b[None, :]

    assert out.shape == (batch, out_dim)
    assert jnp.allclose(out, ref, atol=1e-2, rtol=1e-2), float(jnp.max(jnp.abs(out - ref)))
    assert jnp.allclose(out, ref_f32, atol=0.25, rtol=0.05)

    print("KERNEL_OK")
</pallas_src>

<mosaic_0001>
module attributes {stable_mosaic.version = 11 : i64} {
  func.func @bilinear_kernel(%arg0: i32, %arg1: memref<32x16xf32, #tpu.memory_space<vmem>>, %arg2: memref<32x32xf32, #tpu.memory_space<vmem>>, %arg3: memref<512x128xbf16, #tpu.memory_space<vmem>>, %arg4: memref<1x128xf32, #tpu.memory_space<vmem>>, %arg5: memref<32x128xf32, #tpu.memory_space<vmem>>) attributes {dimension_semantics = [#tpu.dimension_semantics<parallel>], iteration_bounds = array<i64: 2>, scalar_prefetch = 0 : i64, scratch_operands = 0 : i64, tpu.core_type = #tpu.core_type<tc>, window_params = [{transform_indices = @transform_0, window_bounds = array<i64: 32, 16>}, {transform_indices = @transform_1, window_bounds = array<i64: 32, 32>}, {pipeline_mode = #tpu.pipeline_mode<synchronous>, transform_indices = @transform_2, window_bounds = array<i64: 512, 128>}, {pipeline_mode = #tpu.pipeline_mode<synchronous>, transform_indices = @transform_3, window_bounds = array<i64: 1, 128>}, {transform_indices = @transform_4, window_bounds = array<i64: 32, 128>}]} {
    %c0 = arith.constant 0 : index
    %c0_0 = arith.constant 0 : index
    %0 = vector.load %arg1[%c0, %c0_0] : memref<32x16xf32, #tpu.memory_space<vmem>>, vector<32x16xf32>
    %c0_1 = arith.constant 0 : index
    %c0_2 = arith.constant 0 : index
    %1 = vector.load %arg2[%c0_1, %c0_2] : memref<32x32xf32, #tpu.memory_space<vmem>>, vector<32x32xf32>
    %2 = vector.extract_strided_slice %0 {offsets = [0, 0], sizes = [32, 1], strides = [1, 1]} : vector<32x16xf32> to vector<32x1xf32>
    %3 = vector.broadcast %2 : vector<32x1xf32> to vector<32x32xf32>
    %4 = arith.mulf %3, %1 : vector<32x32xf32>
    %5 = vector.extract_strided_slice %0 {offsets = [0, 1], sizes = [32, 1], strides = [1, 1]} : vector<32x16xf32> to vector<32x1xf32>
    %6 = vector.broadcast %5 : vector<32x1xf32> to vector<32x32xf32>
    %7 = arith.mulf %6, %1 : vector<32x32xf32>
    %8 = vector.extract_strided_slice %0 {offsets = [0, 2], sizes = [32, 1], strides = [1, 1]} : vector<32x16xf32> to vector<32x1xf32>
    %9 = vector.broadcast %8 : vector<32x1xf32> to vector<32x32xf32>
    %10 = arith.mulf %9, %1 : vector<32x32xf32>
    %11 = vector.extract_strided_slice %0 {offsets = [0, 3], sizes = [32, 1], strides = [1, 1]} : vector<32x16xf32> to vector<32x1xf32>
    %12 = vector.broadcast %11 : vector<32x1xf32> to vector<32x32xf32>
    %13 = arith.mulf %12, %1 : vector<32x32xf32>
    %14 = vector.extract_strided_slice %0 {offsets = [0, 4], sizes = [32, 1], strides = [1, 1]} : vector<32x16xf32> to vector<32x1xf32>
    %15 = vector.broadcast %14 : vector<32x1xf32> to vector<32x32xf32>
    %16 = arith.mulf %15, %1 : vector<32x32xf32>
    %17 = vector.extract_strided_slice %0 {offsets = [0, 5], sizes = [32, 1], strides = [1, 1]} : vector<32x16xf32> to vector<32x1xf32>
    %18 = vector.broadcast %17 : vector<32x1xf32> to vector<32x32xf32>
    %19 = arith.mulf %18, %1 : vector<32x32xf32>
    %20 = vector.extract_strided_slice %0 {offsets = [0, 6], sizes = [32, 1], strides = [1, 1]} : vector<32x16xf32> to vector<32x1xf32>
    %21 = vector.broadcast %20 : vector<32x1xf32> to vector<32x32xf32>
    %22 = arith.mulf %21, %1 : vector<32x32xf32>
    %23 = vector.extract_strided_slice %0 {offsets = [0, 7], sizes = [32, 1], strides = [1, 1]} : vector<32x16xf32> to vector<32x1xf32>
    %24 = vector.broadcast %23 : vector<32x1xf32> to vector<32x32xf32>
    %25 = arith.mulf %24, %1 : vector<32x32xf32>
    %26 = vector.extract_strided_slice %0 {offsets = [0, 8], sizes = [32, 1], strides = [1, 1]} : vector<32x16xf32> to vector<32x1xf32>
    %27 = vector.broadcast %26 : vector<32x1xf32> to vector<32x32xf32>
    %28 = arith.mulf %27, %1 : vector<32x32xf32>
    %29 = vector.extract_strided_slice %0 {offsets = [0, 9], sizes = [32, 1], strides = [1, 1]} : vector<32x16xf32> to vector<32x1xf32>
    %30 = vector.broadcast %29 : vector<32x1xf32> to vector<32x32xf32>
    %31 = arith.mulf %30, %1 : vector<32x32xf32>
    %32 = vector.extract_strided_slice %0 {offsets = [0, 10], sizes = [32, 1], strides = [1, 1]} : vector<32x16xf32> to vector<32x1xf32>
    %33 = vector.broadcast %32 : vector<32x1xf32> to vector<32x32xf32>
    %34 = arith.mulf %33, %1 : vector<32x32xf32>
    %35 = vector.extract_strided_slice %0 {offsets = [0, 11], sizes = [32, 1], strides = [1, 1]} : vector<32x16xf32> to vector<32x1xf32>
    %36 = vector.broadcast %35 : vector<32x1xf32> to vector<32x32xf32>
    %37 = arith.mulf %36, %1 : vector<32x32xf32>
    %38 = vector.extract_strided_slice %0 {offsets = [0, 12], sizes = [32, 1], strides = [1, 1]} : vector<32x16xf32> to vector<32x1xf32>
    %39 = vector.broadcast %38 : vector<32x1xf32> to vector<32x32xf32>
    %40 = arith.mulf %39, %1 : vector<32x32xf32>
    %41 = vector.extract_strided_slice %0 {offsets = [0, 13], sizes = [32, 1], strides = [1, 1]} : vector<32x16xf32> to vector<32x1xf32>
    %42 = vector.broadcast %41 : vector<32x1xf32> to vector<32x32xf32>
    %43 = arith.mulf %42, %1 : vector<32x32xf32>
    %44 = vector.extract_strided_slice %0 {offsets = [0, 14], sizes = [32, 1], strides = [1, 1]} : vector<32x16xf32> to vector<32x1xf32>
    %45 = vector.broadcast %44 : vector<32x1xf32> to vector<32x32xf32>
    %46 = arith.mulf %45, %1 : vector<32x32xf32>
    %47 = vector.extract_strided_slice %0 {offsets = [0, 15], sizes = [32, 1], strides = [1, 1]} : vector<32x16xf32> to vector<32x1xf32>
    %48 = vector.broadcast %47 : vector<32x1xf32> to vector<32x32xf32>
    %49 = arith.mulf %48, %1 : vector<32x32xf32>
    %50 = tpu.concatenate %4, %7, %10, %13, %16, %19, %22, %25, %28, %31, %34, %37, %40, %43, %46, %49 in 1 : vector<32x32xf32>, vector<32x32xf32>, vector<32x32xf32>, vector<32x32xf32>, vector<32x32xf32>, vector<32x32xf32>, vector<32x32xf32>, vector<32x32xf32>, vector<32x32xf32>, vector<32x32xf32>, vector<32x32xf32>, vector<32x32xf32>, vector<32x32xf32>, vector<32x32xf32>, vector<32x32xf32>, vector<32x32xf32> -> vector<32x512xf32>
    %51 = arith.truncf %50 : vector<32x512xf32> to vector<32x512xbf16>
    %c0_3 = arith.constant 0 : index
    %c0_4 = arith.constant 0 : index
    %52 = vector.load %arg3[%c0_3, %c0_4] : memref<512x128xbf16, #tpu.memory_space<vmem>>, vector<512x128xbf16>
    %cst = arith.constant dense<0.000000e+00> : vector<32x128xf32>
    %53 = tpu.matmul %51, %52, %cst {dimension_numbers = #tpu.dot_dimension_numbers<[1], [0], [0], [1], [0, 0, 1, 1], [], []>} : vector<32x512xbf16>, vector<512x128xbf16>, vector<32x128xf32> -> vector<32x128xf32>
    %c0_5 = arith.constant 0 : index
    %c0_6 = arith.constant 0 : index
    %54 = vector.load %arg4[%c0_5, %c0_6] : memref<1x128xf32, #tpu.memory_space<vmem>>, vector<1x128xf32>
    %55 = vector.broadcast %54 : vector<1x128xf32> to vector<32x128xf32>
    %56 = arith.addf %53, %55 : vector<32x128xf32>
    %c0_7 = arith.constant 0 : index
    %c0_8 = arith.constant 0 : index
    %57 = vector.load %arg5[%c0_7, %c0_8] : memref<32x128xf32, #tpu.memory_space<vmem>>, vector<32x128xf32>
    tpu.vector_store %arg5[%c0_7, %c0_8], %56 {strides = array<i32>} : memref<32x128xf32, #tpu.memory_space<vmem>>, vector<32x128xf32>,
    return
  }
  func.func @transform_0(%arg0: i32) -> (i32, i32) {
    %c0_i32 = arith.constant 0 : i32
    %c0_i32_0 = arith.constant 0 : i32
    return %arg0, %c0_i32 : i32, i32
  }
  func.func @transform_1(%arg0: i32) -> (i32, i32) {
    %c0_i32 = arith.constant 0 : i32
    %c0_i32_0 = arith.constant 0 : i32
    return %arg0, %c0_i32 : i32, i32
  }
  func.func @transform_2(%arg0: i32) -> (i32, i32) {
    %c0_i32 = arith.constant 0 : i32
    %c0_i32_0 = arith.constant 0 : i32
    %c0_i32_1 = arith.constant 0 : i32
    return %c0_i32, %c0_i32_0 : i32, i32
  }
  func.func @transform_3(%arg0: i32) -> (i32, i32) {
    %c0_i32 = arith.constant 0 : i32
    %c0_i32_0 = arith.constant 0 : i32
    %c0_i32_1 = arith.constant 0 : i32
    return %c0_i32, %c0_i32_0 : i32, i32
  }
  func.func @transform_4(%arg0: i32) -> (i32, i32) {
    %c0_i32 = arith.constant 0 : i32
    %c0_i32_0 = arith.constant 0 : i32
    return %arg0, %c0_i32 : i32, i32
  }
}

</mosaic_0001>

<bundles_post_ra>
// kernel: tpu_custom_call.1
= control target key start
LH: loop header
LB: loop body
LE: loop exit
PB: predicated region body
PF: predicated region fallthrough
CT: control target
= control target key end

     0   :  { %9 = vsyncpa [#allocation3], 0  ;;  %s2290_s0 = inlined_call_operand.vmem [shape: f32[64,16], index: 0, kind: input, shape index: {}]   ;;  %s2291_s1 = inlined_call_operand.vmem [shape: f32[64,32], index: 1, kind: input, shape index: {}]   ;;  %s2292_s2 = inlined_call_operand.hbm [shape: bf16[512,128], index: 2, kind: input, shape index: {}]   ;;  %s2293_s3 = inlined_call_operand.vmem [shape: f32[1,128], index: 3, kind: input, shape index: {}]   ;;  %s2294_s4 = inlined_call_operand.hbm [shape: f32[64,128], index: 4, kind: output, shape index: {}]  }
   0x1   :  { %10 = vsyncpa [#allocation4], 0 }
   0x2   :  { %12 = vsyncpa [#allocation4 + $0x1], 0  ;;  %s1806_s15 = smov 0   ;;  %s1808_s16 = smov 0  }
   0x3   :  { %s1810_s17 = smov 0   ;;  %s1812_s18 = smov 0  }
   0x4 LB: > { %s1827_s19 = sadd.s32 4294967295, %s1754_s18   ;;  %s1285_s20 = sadd.s32 4294967294, %s1754_s18   ;;  %s1754_s18 = sphi %s1812_s18, %s2310_s18   ;;  %s1750_s17 = sphi %s1810_s17, %s2309_s17   ;;  %s1746_s16 = sphi %s1808_s16, %s2308_s16   ;;  %s1742_s15 = sphi %s1806_s15, %s2307_s15  }
   0x5   : > { %s1831_s21 = sadd.s32 1, %s1754_s18   ;;  %s119_s22 = sadd.s32 1, %s1750_s17 }
   0x6   : > { %s116_s23 = ssub.s32 %s1754_s18, %s1831_s21  ;;  %p129_p0 = scmp.ne.s32.totalorder %s1750_s17, %s1746_s16 }
   0x7   : > { %p117_p1 = scmp.eq.s32.totalorder %s116_s23, 0  ;;  %p130_p2 = scmp.eq.s32.totalorder %s1827_s19, 1 }
   0x8   : > { %p135_p3 = scmp.ne.s32.totalorder %s1746_s16, %s1742_s15  ;;  %p136_p4 = scmp.eq.s32.totalorder %s1285_s20, 1 }
   0x9   : > { %s1842_s24 = scalar_select %p117_p1, %s1750_s17, %s119_s22  }
   0xa   : > { %p1844_p5 = por %p130_p2, %p129_p0  ;;  %p1848_p6 = por %p136_p4, %p135_p3 }
   0xb   : > { %p1286_p7 = scmp.ge.s32.totalorder %s1754_s18, 1  ;;  %p143_p8 = scmp.lt.s32.totalorder %s1754_s18, 3 }
   0xc   : > { %s2298_s25 = scalar_select %p1844_p5, 1, 0 }
   0xd   : > { %s2299_s26 = scalar_select %p1848_p6, 1, 0 }
   0xe   : > { %p2295_p9 = scmp.eq.s32.totalorder %s1827_s19, 0  ;;  %p1855_p10 = pnand %p1286_p7, %p143_p8 }
   0xf   : > { %s1756_s28 = smov [#allocation2]   ;;  %s1660_s7 = scalar_lea.hbm %s2292_s2, 4096 }
  0x10   : > { %s2300_s27 = scalar_select %p1855_p10, 1, 0 }
  0x11   : > { %s155_s29 = sshll.u32 %s1756_s28, 4  ;;  %p1397_p11 = pneg %p1855_p10  ;;  %s156_s29 = int_to_ptr.vmem [resolvable:$true] %s155_s29 }
  0x12   : > { %p1661_p13 = scmp.ne.s32.totalorder %s2292_s2, %s1660_s7  ;;  %p1667_p3 = scmp.lt.u32.totalorder %s1660_s7, %s2292_s2 }
  0x13   : > { %p1863_p12 = pnand %p2295_p9, %p1397_p11 }
  0x15   : > { %p1662_p0 = pneg %p1863_p12 }
  0x17   : > { %p1663_p1 = pnand %p1662_p0, %p1661_p13 }
  0x19   : > { %p1664_p2 = pneg %p1663_p1 }
  0x1b   : > { %p1669_p4 = pnand %p1667_p3, %p1664_p2 }
  0x1d   : > { %1672 = shalt.err (!%p1669_p4)
}
  0x1e   : > { %s1673_s12 = scalar_lea.vmem %s156_s29, 4096  ;;  %p1681_p9 = scmp.lt.s32.totalorder %s156_s29, %s156_s29 }
  0x1f   : > { %p1674_p7 = scmp.ne.s32.totalorder %s156_s29, %s1673_s12  ;;  %p1682_p6 = scmp.lt.s32.totalorder %s1673_s12, %s1673_s12 }
  0x21   : > { %p1676_p8 = pnand %p1674_p7, %p1662_p0  ;;  %p1683_p5 = por %p1682_p6, %p1681_p9 }
  0x23   : > { %p1677_p11 = pneg %p1676_p8 }
  0x25   : > { %p1684_p10 = pnand %p1683_p5, %p1677_p11 }
  0x27   : > { %1687 = shalt.err (!%p1684_p10)
}
  0x28   : > { %s1757_s13 = smov 64   ;;  %s1758_s14 = smov 4  }
  0x29   : > { %1400 = dma.hbm_to_vmem [thread:$0]  (!%p1863_p12), %s2292_s2, 4096, %s156_s29, [#allocation3], %s1757_s13, %s1757_s13, %s1758_s14  }
  0x2a   : > { %p2302_p13 = scmp.ne.s32.totalorder %s2300_s27, 0 }
  0x2b   : > { %p2303_p1 = scmp.eq.s32.totalorder (!%p2302_p13), %s1827_s19, 0 }
  0x2c   : > { %192 = sbr.rel (%p2302_p13) target bundleno = 687 (0x2af), region = 36 }
  0x33   : > { %1733 = dma.done.wait (%p2303_p1), [#allocation3], 4096   ;;  %p2304_p0 = pmov %p2303_p1 }
  0x34   : > { %s1292_s23 = sshll.u32 %s1827_s19, 2  ;;  %v1759_v0 = vmov 5   ;;  %v1760_v1 = vmov 1   ;;  %v1761_v5 = vmov 6   ;;  %v1762_v7 = vmov 2   ;;  %s1775_s8 = smov 64  }
  0x35   : > { %1735 = vsyncadd (%p2304_p0), [#allocation3], 4294963200  ;;  %1464 = vset.pattern.permute.xlu0 %v1759_v0  ;;  %1465 = vset.pattern.permute.xlu1 %v1760_v1  ;;  %p224_p5 = scmp.lt.s32.totalorder %s1292_s23, 7  ;;  %v1763_v8 = vmov 7   ;;  %v1764_v9 = vmov 13   ;;  %v1765_v10 = vmov 3  }
  0x36   : > { %v1766_v11 = vmov 9   ;;  %v1767_v12 = vmov 14   ;;  %v1768_v13 = vmov 10   ;;  %v1769_v14 = vmov 15   ;;  %s1776_s9 = smov 32   ;;  %v1628_v57 = vld [vmem:[#allocation2 + $0x40] sm:$0xff]  }
  0x37   : > { %s2312_s23 = smov (!%p224_p5, %s1292_s23), 7  ;;  %v1770_v15 = vmov 11   ;;  %v1771_v16 = vmov 4   ;;  %v1772_v17 = vmov 0   ;;  %v1773_v18 = vmov 12   ;;  %v1629_v60 = vld [vmem:[#allocation2] sm:$0xff]   ;;  %1335 = vmatprep.subr.bf16.mxu0 %v1628_v57 }
  0x38   : > { %s1293_s27 = sshll.u32 %s2312_s23, 3  ;;  %v1774_v19 = vmov 8   ;;  %1336 = vmatpush3.bf16.msra.mxu0 %v1629_v60  ;;  %v1630_v61 = vld [vmem:[#allocation2 + $0x48] sm:$0xff]   ;;  %s1777_s10 = smov 96   ;;  %v1652_v60 = vld [vmem:[#allocation2 + $0x78] sm:$0xff]   ;;  %vm761_vm0 = vcmask 261120  }
  0x39   : > { %s227_s30 = scalar_lea.vmem %s2290_s0, %s1293_s27  ;;  %s1986_s7 = scalar_lea.vmem %s2291_s1, %s1293_s27  ;;  %v1631_v63 = vld [vmem:[#allocation2 + $0x8] sm:$0xff]   ;;  %1337 = vmatprep.subr.bf16.mxu0 %v1630_v61  ;;  %vm766_vm1 = vcmask 523264   ;;  %vm771_vm2 = vcmask 785408  }
  0x3a   : > { %v1900_v2 = vld [vmem:[%s227_s30] sm:$0xff]  ;;  %v1904_v3 = vld [vmem:[%s227_s30 + $0x8] sm:$0xff]  ;;  %v1906_v4 = vld [vmem:[%s227_s30 + $0x18] sm:$0xff]  ;;  %s220_s11 = sand.u32 1, %s1746_s16   ;;  %s1334_s23 = sshll.u32 %s1827_s19, 9 }
  0x3b   : > { %270 = vperm.xlu1 %1465, %v1900_v2   ;;  %350 = vperm.xlu0 %1464, %v1900_v2   ;;  %v1914_v6 = vld [vmem:[%s227_s30 + $0x10] sm:$0xff]  ;;  %v1990_v26 = vld [vmem:[%s1986_s7] sm:$0xff]  ;;  %v1993_v27 = vld [vmem:[%s1986_s7 + $0x8] sm:$0xff]  ;;  %s1291_s14 = sshll.u32 %s220_s11, 5  ;;  %s2245_s29 = scalar_lea.hbm %s2294_s4, %s1334_s23 }
  0x3c   : > { %1338 = vmatpush3.bf16.msra.mxu0 %v1631_v63  ;;  %v2091_v57 = vld [vmem:[%s1986_s7 + $0x10] sm:$0xff]  ;;  %s222_s20 = scalar_lea.vmem [#allocation5], %s1291_s14  ;;  %s2249_s30 = scalar_lea.sflag [#allocation4], %s220_s11 }
  0x3d   : > { %s1199_s22 = sshll.u32 %s222_s20, 4  ;;  %p2305_p9 = scmp.ne.s32.totalorder %s2298_s25, 0  ;;  %s2240_s22 = int_to_ptr.vmem [resolvable:$true] %s1199_s22 }
  0x3e   : > { %s1688_s19 = scalar_lea.vmem %s2240_s22, 512  ;;  %s1778_s5 = smov [#allocation5]  }
  0x3f   : > { %274 = vperm.xlu1 %1465, %v1904_v3   ;;  %354 = vperm.xlu0 %1464, %v1904_v3   ;;  %p1689_p6 = scmp.ne.s32.totalorder %s2240_s22, %s1688_s19  ;;  %s1692_s6 = sshll.u32 %s1778_s5, 4  ;;  %s1693_s6 = int_to_ptr.vmem [resolvable:$false] %s1692_s6 }
  0x40   : > { %p1695_p2 = scmp.lt.s32.totalorder %s2240_s22, %s1693_s6 }
  0x41   : > { %p1690_p10 = pnand %p1689_p6, %p2305_p9 }
  0x43   : > { %1466 = vset.pattern.permute.xlu1 %v1761_v5  ;;  %362 = vperm.xlu0 %1464, %v1906_v4   ;;  %p1691_p12 = pneg %p1690_p10 }
  0x44   : > { %374 = vperm.xlu1 %1466, %v1904_v3  }
  0x47   : > { %1477 = vset.pattern.permute.xlu0 %v1761_v5 }
  0x48   : > { %1467 = vset.pattern.permute.xlu1 %v1762_v7  ;;  %370 = vperm.xlu0 %1477, %v1900_v2  }
  0x49   : > { %290 = vperm.xlu1 %1467, %v1900_v2  }
  0x4c   : > { %378 = vperm.xlu0 %1477, %v1914_v6  }
  0x4d   : > { %1468 = vset.pattern.permute.xlu1 %v1763_v8 }
  0x4e   : > { %390 = vperm.xlu1 %1468, %v1900_v2  }
  0x50   : > { %1479 = vset.pattern.permute.xlu0 %v1762_v7 }
  0x51   : > { %294 = vperm.xlu0 %1479, %v1904_v3  }
  0x52   : > { %394 = vperm.xlu1 %1468, %v1904_v3  }
  0x55   : > { %302 = vperm.xlu0 %1479, %v1906_v4  }
  0x56   : > { %1469 = vset.pattern.permute.xlu1 %v1764_v9 }
  0x57   : > { %514 = vperm.xlu1 %1469, %v1904_v3  }
  0x59   : > { %1482 = vset.pattern.permute.xlu0 %v1764_v9 }
  0x5a   : > { %510 = vperm.xlu0 %1482, %v1900_v2  }
  0x5b   : > { %1470 = vset.pattern.permute.xlu1 %v1765_v10 }
  0x5c   : > { %310 = vperm.xlu1 %1470, %v1900_v2  }
  0x5e   : > { %518 = vperm.xlu0 %1482, %v1914_v6  }
  0x60   : > { %1471 = vset.pattern.permute.xlu1 %v1766_v11 }
  0x61   : > { %430 = vperm.xlu1 %1471, %v1900_v2  }
  0x62   : > { %1484 = vset.pattern.permute.xlu0 %v1765_v10 }
  0x63   : > { %314 = vperm.xlu0 %1484, %v1904_v3  }
  0x65   : > { %434 = vperm.xlu1 %1471, %v1904_v3  }
  0x67   : > { %322 = vperm.xlu0 %1484, %v1906_v4  }
  0x69   : > { %1472 = vset.pattern.permute.xlu1 %v1767_v12 }
  0x6a   : > { %534 = vperm.xlu1 %1472, %v1904_v3  }
  0x6b   : > { %1487 = vset.pattern.permute.xlu0 %v1767_v12 }
  0x6c   : > { %530 = vperm.xlu0 %1487, %v1900_v2  }
  0x6e   : > { %1473 = vset.pattern.permute.xlu1 %v1768_v13 }
  0x6f   : > { %450 = vperm.xlu1 %1473, %v1900_v2  }
  0x70   : > { %538 = vperm.xlu0 %1487, %v1914_v6  }
  0x73   : > { %1474 = vset.pattern.permute.xlu1 %v1769_v14 }
  0x74   : > { %550 = vperm.xlu1 %1474, %v1900_v2   ;;  %1489 = vset.pattern.permute.xlu0 %v1768_v13 }
  0x75   : > { %454 = vperm.xlu0 %1489, %v1904_v3  }
  0x78   : > { %554 = vperm.xlu1 %1474, %v1904_v3  }
  0x79   : > { %462 = vperm.xlu0 %1489, %v1906_v4  }
  0x7c   : > { %1475 = vset.pattern.permute.xlu1 %v1770_v15 }
  0x7d   : > { %474 = vperm.xlu1 %1475, %v1904_v3   ;;  %1492 = vset.pattern.permute.xlu0 %v1770_v15 }
  0x7e   : > { %470 = vperm.xlu0 %1492, %v1900_v2  }
  0x81   : > { %1476 = vset.pattern.permute.xlu1 %v1759_v0 }
  0x82   : > { %358 = vperm.xlu1 %1476, %v1914_v6   ;;  %478 = vperm.xlu0 %1492, %v1914_v6  }
  0x86   : > { %1478 = vset.pattern.permute.xlu1 %v1760_v1  ;;  %1496 = vset.pattern.permute.xlu0 %v1771_v16 }
  0x87   : > { %278 = vperm.xlu1 %1478, %v1914_v6   ;;  %334 = vperm.xlu0 %1496, %v1904_v3  }
  0x8b   : > { %282 = vperm.xlu1 %1478, %v1906_v4   ;;  %1501 = vset.pattern.permute.xlu0 %v1772_v17 }
  0x8c   : > { %257 = vperm.xlu0 %1501, %v1914_v6  }
  0x8f   : > { %1480 = vset.pattern.permute.xlu1 %v1761_v5  ;;  %v1632_v5 = vld [vmem:[#allocation2 + $0x50] sm:$0xff]  }
  0x90   : > { %382 = vperm.xlu1 %1480, %v1906_v4   ;;  %1502 = vset.pattern.permute.xlu0 %v1773_v18 }
  0x91   : > { %490 = vperm.xlu0 %1502, %v1900_v2   ;;  %1339 = vmatprep.subr.bf16.mxu0 %v1632_v5 }
  0x94   : > { %1481 = vset.pattern.permute.xlu1 %v1762_v7 }
  0x95   : > { %298 = vperm.xlu1 %1481, %v1914_v6   ;;  %498 = vperm.xlu0 %1502, %v1914_v6  }
  0x99   : > { %1483 = vset.pattern.permute.xlu1 %v1763_v8  ;;  %1509 = vset.pattern.permute.xlu0 %v1774_v19 }
  0x9a   : > { %398 = vperm.xlu1 %1483, %v1914_v6   ;;  %414 = vperm.xlu0 %1509, %v1904_v3  }
  0x9e   : > { %402 = vperm.xlu1 %1483, %v1906_v4  }
  0xa2   : > { %1485 = vset.pattern.permute.xlu1 %v1764_v9 }
  0xa3   : > { %522 = vperm.xlu1 %1485, %v1906_v4  }
  0xa7   : > { %1486 = vset.pattern.permute.xlu1 %v1765_v10  ;;  %v1633_v10 = vld [vmem:[#allocation2 + $0x10] sm:$0xff]  }
  0xa8   : > { %318 = vperm.xlu1 %1486, %v1914_v6   ;;  %1340 = vmatpush3.bf16.msra.mxu0 %v1633_v10  ;;  %v1657_v10 = vld [vmem:[#allocation2 + $0xb0] sm:$0xff]  }
  0xac   : > { %1488 = vset.pattern.permute.xlu1 %v1766_v11  ;;  %v1634_v11 = vld [vmem:[#allocation2 + $0xc0] sm:$0xff]  }
  0xad   : > { %438 = vperm.xlu1 %1488, %v1914_v6   ;;  %1363 = vmatprep.subr.bf16.mxu1 %v1634_v11 }
  0xb1   : > { %442 = vperm.xlu1 %1488, %v1906_v4  }
  0xb5   : > { %1490 = vset.pattern.permute.xlu1 %v1767_v12  ;;  %v1635_v12 = vld [vmem:[#allocation2 + $0x80] sm:$0xff]  }
  0xb6   : > { %542 = vperm.xlu1 %1490, %v1906_v4   ;;  %1364 = vmatpush3.bf16.msra.mxu1 %v1635_v12 }
  0xba   : > { %1491 = vset.pattern.permute.xlu1 %v1768_v13  ;;  %v1972_v20 = vpop.permute.xlu1 %270  ;;  %v351_v21 = vpop.permute.xlu0 %350 }
  0xbb   : > { %458 = vperm.xlu1 %1491, %v1914_v6   ;;  %v365_v53 = vmul.f32 %v351_v21, %v1990_v26  ;;  %v285_v7 = vmul.f32 %v1972_v20, %v1990_v26 }
  0xbe   : > { %v1975_v22 = vpop.permute.xlu1 %274  ;;  %v355_v23 = vpop.permute.xlu0 %354 }
  0xbf   : > { %1493 = vset.pattern.permute.xlu1 %v1769_v14  ;;  %v366_v54 = vmul.f32 %v355_v23, %v1993_v27  ;;  %v286_v1 = vmul.f32 %v1975_v22, %v1993_v27 }
  0xc0   : > { %558 = vperm.xlu1 %1493, %v1914_v6  }
  0xc1   : > { %v1504_v58 = vpack.i.bf16 %v366_v54, %v365_v53  ;;  %v1651_v53 = vld [vmem:[#allocation2 + $0xa0] sm:$0xff]  }
  0xc2   : > { %v1979_v24 = vpop.permute.xlu0 %362 }
  0xc3   : > { %v375_v25 = vpop.permute.xlu1 %374 }
  0xc4   : > { %562 = vperm.xlu1 %1493, %v1906_v4   ;;  %v386_v29 = vmul.f32 %v375_v25, %v1993_v27  ;;  %v1640_v25 = vld [vmem:[#allocation2 + $0x60] sm:$0xff]  }
  0xc7   : > { %v371_v28 = vpop.permute.xlu0 %370 }
  0xc8   : > { %v385_v30 = vmul.f32 %v371_v28, %v1990_v26  ;;  %1494 = vset.pattern.permute.xlu1 %v1770_v15  ;;  %v1997_v31 = vpop.permute.xlu1 %290  ;;  %v1636_v15 = vld [vmem:[#allocation2 + $0x58] sm:$0xff]  }
  0xc9   : > { %482 = vperm.xlu1 %1494, %v1906_v4   ;;  %1341 = vmatprep.subr.bf16.mxu0 %v1636_v15  ;;  %v305_v28 = vmul.f32 %v1997_v31, %v1990_v26  ;;  %v1645_v31 = vld [vmem:[#allocation2 + $0x28] sm:$0xff]  }
  0xca   : > { %v1516_v32 = vpack.i.bf16 %v386_v29, %v385_v30  ;;  %v1642_v29 = vld [vmem:[#allocation2 + $0xd0] sm:$0xff]  }
  0xcb   : > { %v2000_v33 = vpop.permute.xlu0 %378 }
  0xcc   : > { %1517 = vrot.lane.b32.xlu0 %v1516_v32, %s1775_s8  ;;  %v1643_v32 = vld [vmem:[#allocation2 + $0x90] sm:$0xff]  }
  0xcd   : > { %1495 = vset.pattern.permute.xlu1 %v1771_v16  ;;  %v2004_v34 = vpop.permute.xlu1 %390 }
  0xce   : > { %330 = vperm.xlu1 %1495, %v1900_v2  }
  0xd0   : > { %422 = vperm.xlu0 %1509, %v1906_v4   ;;  %v2008_v35 = vpop.permute.xlu0 %294 }
  0xd1   : > { %v2010_v36 = vpop.permute.xlu1 %394  ;;  %v306_v20 = vmul.f32 %v2008_v35, %v1993_v27 }
  0xd2   : > { %1497 = vset.pattern.permute.xlu1 %v1772_v17 }
  0xd3   : > { %247 = vperm.xlu1 %1497, %v1900_v2   ;;  %v1522_v35 = vpack.i.bf16 %v306_v20, %v305_v28  ;;  %v387_v20 = vmul.f32 %v2000_v33, %v2091_v57 }
  0xd4   : > { %v2014_v37 = vpop.permute.xlu0 %302  ;;  %1627 = vset.pattern.permute.xlu0 %v1769_v14  ;;  %v1511_v14 = vpack.i.bf16 %v286_v1, %v285_v7  ;;  %v1655_v1 = vld [vmem:[#allocation2 + $0xa8] sm:$0xff]  }
  0xd6   : > { %v515_v38 = vpop.permute.xlu1 %514 }
  0xd7   : > { %252 = vperm.xlu1 %1497, %v1904_v3   ;;  %v526_v40 = vmul.f32 %v515_v38, %v1993_v27  ;;  %v406_v38 = vmul.f32 %v2010_v36, %v1993_v27 }
  0xd9   : > { %v511_v39 = vpop.permute.xlu0 %510 }
  0xda   : > { %v525_v41 = vmul.f32 %v511_v39, %v1990_v26 }
  0xdb   : > { %1498 = vset.pattern.permute.xlu1 %v1773_v18  ;;  %v2021_v42 = vpop.permute.xlu1 %310 }
  0xdc   : > { %v1532_v43 = vpack.i.bf16 %v526_v40, %v525_v41  ;;  %494 = vperm.xlu1 %1498, %v1904_v3   ;;  %v1644_v40 = vld [vmem:[#allocation2 + $0x68] sm:$0xff]   ;;  %v1646_v41 = vld [vmem:[#allocation2 + $0xd8] sm:$0xff]  }
  0xdd   : > { %v2024_v44 = vpop.permute.xlu0 %518 }
  0xde   : > { %1533 = vrot.lane.b32.xlu0 %v1532_v43, %s1776_s9  ;;  %v1647_v43 = vld [vmem:[#allocation2 + $0x98] sm:$0xff]   ;;  %v527_v33 = vmul.f32 %v2024_v44, %v2091_v57 }
  0xe0   : > { %1499 = vset.pattern.permute.xlu1 %v1774_v19  ;;  %v431_v45 = vpop.permute.xlu1 %430 }
  0xe1   : > { %410 = vperm.xlu1 %1499, %v1900_v2   ;;  %v445_v48 = vmul.f32 %v431_v45, %v1990_v26 }
  0xe2   : > { %v2029_v46 = vpop.permute.xlu0 %314 }
  0xe3   : > { %v326_v36 = vmul.f32 %v2029_v46, %v1993_v27 }
  0xe4   : > { %v435_v47 = vpop.permute.xlu1 %434 }
  0xe5   : > { %v446_v49 = vmul.f32 %v435_v47, %v1993_v27  ;;  %1500 = vset.pattern.permute.xlu1 %v1771_v16  ;;  %v1637_v16 = vld [vmem:[#allocation2 + $0x18] sm:$0xff]  }
  0xe6   : > { %338 = vperm.xlu1 %1500, %v1914_v6   ;;  %v2035_v50 = vpop.permute.xlu0 %322  ;;  %1342 = vmatpush3.bf16.msra.mxu0 %v1637_v16 }
  0xe7   : > { %v1542_v51 = vpack.i.bf16 %v446_v49, %v445_v48  ;;  %1343 = vmatprep.subr.bf16.mxu0 %v1640_v25  ;;  %v1648_v48 = vld [vmem:[#allocation2 + $0x70] sm:$0xff]  }
  0xe8   : > { %v1649_v49 = vld [vmem:[#allocation2 + $0x30] sm:$0xff]  }
  0xe9   : > { %v2037_v52 = vpop.permute.xlu1 %534  ;;  %1543 = vrot.lane.b32.xlu0 %v1542_v51, %s1776_s9  ;;  %v1650_v51 = vld [vmem:[#allocation2 + $0xe0] sm:$0xff]  }
  0xea   : > { %342 = vperm.xlu1 %1500, %v1906_v4  }
  0xeb   : > { %v2043_v55 = vpop.permute.xlu0 %530 }
  0xec   : > { %v545_v46 = vmul.f32 %v2043_v55, %v1990_v26  ;;  %v1654_v55 = vld [vmem:[#allocation2 + $0xe8] sm:$0xff]  }
  0xee   : > { %1503 = vset.pattern.permute.xlu1 %v1772_v17  ;;  %v451_v56 = vpop.permute.xlu1 %450  ;;  %v1638_v17 = vld [vmem:[#allocation2 + $0xc8] sm:$0xff]  }
  0xef   : > { %262 = vperm.xlu1 %1503, %v1906_v4   ;;  %v2047_v59 = vpop.permute.xlu0 %538  ;;  %v465_v2 = vmul.f32 %v451_v56, %v1990_v26  ;;  %1365 = vmatprep.subr.bf16.mxu1 %v1638_v17  ;;  %v2088_v56 = vld [vmem:[%s1986_s7 + $0x18] sm:$0xff]  ;;  %s1694_s7 = scalar_lea.vmem %s1693_s6, 1024 }
  0xf0   : > { %v308_v16 = vmul.f32 %v2014_v37, %v2088_v56  ;;  %p1696_p3 = scmp.lt.s32.totalorder %s1694_s7, %s1688_s19 }
  0xf2   : > { %p1697_p4 = por %p1696_p3, %p1695_p2 }
  0xf3   : > { %v2049_v62 = vpop.permute.xlu1 %550  ;;  %1505 = vrot.lane.b32.xlu1 %v1504_v58, %s1776_s9 }
  0xf4   : > { %v455_v0 = vpop.permute.xlu0 %454  ;;  %1510 = vset.pattern.permute.xlu1 %v1773_v18  ;;  %p1698_p7 = pnand %p1697_p4, %p1691_p12 }
  0xf5   : > { %v466_v3 = vmul.f32 %v455_v0, %v1993_v27  ;;  %v1653_v0 = vld [vmem:[#allocation2 + $0x38] sm:$0xff]  }
  0xf7   : > { %v1552_v8 = vpack.i.bf16 %v466_v3, %v465_v2  ;;  %v2059_v9 = vpop.permute.xlu1 %554  ;;  %502 = vperm.xlu1 %1510, %v1906_v4   ;;  %v1639_v4 = vld [vmem:[#allocation2 + $0x88] sm:$0xff]  }
  0xf8   : > { %v2062_v13 = vpop.permute.xlu0 %462  ;;  %1366 = vmatpush3.bf16.msra.mxu1 %v1639_v4  ;;  %v566_v3 = vmul.f32 %v2059_v9, %v1993_v27  ;;  %v368_v9 = vmul.f32 %v1979_v24, %v2088_v56 }
  0xf9   : > { %1553 = vrot.lane.b32.xlu0 %v1552_v8, %s1775_s8  ;;  %1367 = vmatprep.subr.bf16.mxu1 %v1642_v29  ;;  %v1656_v8 = vld [vmem:[#allocation2 + $0xf0] sm:$0xff]  }
  0xfb   : > { %1512 = vrot.lane.b32.xlu1 %v1511_v14, %s1776_s9  ;;  %v1658_v14 = vld [vmem:[#allocation2 + $0xf8] sm:$0xff]  }
  0xfc   : > { %v475_v18 = vpop.permute.xlu1 %474  ;;  %1521 = vset.pattern.permute.xlu1 %v1774_v19  ;;  %v1641_v19 = vld [vmem:[#allocation2 + $0x20] sm:$0xff]   ;;  %1368 = vmatpush3.bf16.msra.mxu1 %v1643_v32 }
  0xfd   : > { %v486_v21 = vmul.f32 %v475_v18, %v1993_v27  ;;  %v471_v22 = vpop.permute.xlu0 %470  ;;  %1344 = vmatpush3.bf16.msra.mxu0 %v1641_v19  ;;  %1369 = vmatprep.subr.bf16.mxu1 %v1646_v41 }
  0xfe   : > { %v485_v23 = vmul.f32 %v471_v22, %v1990_v26  ;;  %1345 = vmatprep.subr.bf16.mxu0 %v1644_v40 }
  0xff   : > { %418 = vperm.xlu1 %1521, %v1914_v6   ;;  %v405_v6 = vmul.f32 %v2004_v34, %v1990_v26  ;;  %v325_v34 = vmul.f32 %v2021_v42, %v1990_v26  ;;  %v546_v42 = vmul.f32 %v2037_v52, %v1993_v27  ;;  %v565_v52 = vmul.f32 %v2049_v62, %v1990_v26  ;;  %v1659_v62 = vld [vmem:[#allocation2 + $0xb8] sm:$0xff]  }
 0x100   : > { %v1562_v30 = vpack.i.bf16 %v486_v21, %v485_v23  ;;  %1370 = vmatpush3.bf16.msra.mxu1 %v1647_v43 }
 0x101   : > { %v359_v39 = vpop.permute.xlu1 %358  ;;  %v1527_v45 = vpack.i.bf16 %v406_v38, %v405_v6  ;;  %1346 = vmatpush3.bf16.msra.mxu0 %v1645_v31  ;;  %v1537_v54 = vpack.i.bf16 %v326_v36, %v325_v34  ;;  %1371 = vmatprep.subr.bf16.mxu1 %v1650_v51  ;;  %v1547_v2 = vpack.i.bf16 %v546_v42, %v545_v46 }
 0x102   : > { %1563 = vrot.lane.b32.xlu0 %v1562_v30, %s1777_s10  ;;  %1347 = vmatprep.subr.bf16.mxu0 %v1648_v48  ;;  %v1557_v11 = vpack.i.bf16 %v566_v3, %v565_v52  ;;  %v367_v12 = vmul.f32 %v359_v39, %v2091_v57  ;;  %v468_v48 = vmul.f32 %v2062_v13, %v2088_v56 }
 0x103   : > { %1523 = vrot.lane.b32.xlu1 %v1522_v35, %s1775_s8  ;;  %v328_v35 = vmul.f32 %v2035_v50, %v2088_v56 }
 0x104   : > { %1372 = vmatpush3.bf16.msra.mxu1 %v1651_v53  ;;  %v1567_v17 = vpack.i.bf16 %v368_v9, %v367_v12 }
 0x105   : > { %1348 = vmatpush3.bf16.msra.mxu0 %v1649_v49  ;;  %1373 = vmatprep.subr.bf16.mxu1 %v1654_v55 }
 0x106   : > { %v279_v47 = vpop.permute.xlu1 %278  ;;  %1349 = vmatprep.subr.bf16.mxu0 %v1652_v60 }
 0x107   : > { %1528 = vrot.lane.b32.xlu1 %v1527_v45, %s1777_s10  ;;  %v287_v61 = vmul.f32 %v279_v47, %v2091_v57  ;;  %v547_v45 = vmul.f32 %v2047_v59, %v2091_v57 }
 0x108   : > { %1374 = vmatpush3.bf16.msra.mxu1 %v1655_v1 }
 0x109   : > { %1350 = vmatpush3.bf16.msra.mxu0 %v1653_v0  ;;  %1375 = vmatprep.subr.bf16.mxu1 %v1656_v8 }
 0x10a   : > { %v283_v58 = vpop.permute.xlu1 %282 }
 0x10b   : > { %v288_v63 = vmul.f32 %v283_v58, %v2088_v56  ;;  %1538 = vrot.lane.b32.xlu1 %v1537_v54, %s1777_s10  ;;  %v479_v58 = vpop.permute.xlu0 %478 }
 0x10c   : > { %1376 = vmatpush3.bf16.msra.mxu1 %v1657_v10  ;;  %v487_v42 = vmul.f32 %v479_v58, %v2091_v57 }
 0x10d   : > { %v1572_v5 = vpack.i.bf16 %v288_v63, %v287_v61  ;;  %1377 = vmatprep.subr.bf16.mxu1 %v1658_v14 }
 0x10f   : > { %v383_v7 = vpop.permute.xlu1 %382  ;;  %1548 = vrot.lane.b32.xlu1 %v1547_v2, %s1775_s8  ;;  %1573 = vrot.lane.b32.xlu0 %v1572_v5, %s1776_s9  ;;  %v335_v1 = vpop.permute.xlu0 %334 }
 0x110   : > { %v388_v18 = vmul.f32 %v383_v7, %v2088_v56  ;;  %1378 = vmatpush3.bf16.msra.mxu1 %v1659_v62 }
 0x112   : > { %v1577_v24 = vpack.i.bf16 %v388_v18, %v387_v20  ;;  %v346_v18 = vmul.f32 %v335_v1, %v1993_v27 }
 0x113   : > { %1558 = vrot.lane.b32.xlu1 %v1557_v11, %s1777_s10  ;;  %v2145_v3 = vpop.permute.xlu0 %257 }
 0x114   : > { %v299_v15 = vpop.permute.xlu1 %298 }
 0x115   : > { %v307_v4 = vmul.f32 %v299_v15, %v2091_v57 }
 0x117   : > { %v1582_v21 = vpack.i.bf16 %v308_v16, %v307_v4  ;;  %1568 = vrot.lane.b32.xlu1 %v1567_v17, %s1776_s9  ;;  %v491_v52 = vpop.permute.xlu0 %490 }
 0x119   : > { %v399_v22 = vpop.permute.xlu1 %398  ;;  %1583 = vrot.lane.b32.xlu0 %v1582_v21, %s1775_s8 }
 0x11a   : > { %v407_v23 = vmul.f32 %v399_v22, %v2091_v57 }
 0x11b   : > { %1578 = vrot.lane.b32.xlu1 %v1577_v24, %s1775_s8  ;;  %v2151_v10 = vpop.permute.xlu0 %498 }
 0x11d   : > { %v403_v37 = vpop.permute.xlu1 %402 }
 0x11e   : > { %v408_v25 = vmul.f32 %v403_v37, %v2088_v56 }
 0x11f   : > { %v415_v12 = vpop.permute.xlu0 %414 }
 0x120   : > { %v1587_v28 = vpack.i.bf16 %v408_v25, %v407_v23 }
 0x122   : > { %v523_v19 = vpop.permute.xlu1 %522  ;;  %1588 = vrot.lane.b32.xlu1 %v1587_v28, %s1777_s10 }
 0x123   : > { %v528_v29 = vmul.f32 %v523_v19, %v2088_v56 }
 0x125   : > { %v1592_v30 = vpack.i.bf16 %v528_v29, %v527_v33 }
 0x127   : > { %v319_v32 = vpop.permute.xlu1 %318  ;;  %1593 = vrot.lane.b32.xlu0 %v1592_v30, %s1776_s9 }
 0x128   : > { %v327_v38 = vmul.f32 %v319_v32, %v2091_v57 }
 0x12a   : > { %v1597_v39 = vpack.i.bf16 %v328_v35, %v327_v38 }
 0x12c   : > { %v439_v40 = vpop.permute.xlu1 %438  ;;  %1598 = vrot.lane.b32.xlu1 %v1597_v39, %s1777_s10 }
 0x12d   : > { %v447_v31 = vmul.f32 %v439_v40, %v2091_v57 }
 0x130   : > { %v443_v6 = vpop.permute.xlu1 %442 }
 0x131   : > { %v448_v44 = vmul.f32 %v443_v6, %v2088_v56 }
 0x133   : > { %v1602_v41 = vpack.i.bf16 %v448_v44, %v447_v31 }
 0x135   : > { %v543_v43 = vpop.permute.xlu1 %542  ;;  %1603 = vrot.lane.b32.xlu0 %v1602_v41, %s1776_s9 }
 0x136   : > { %v548_v50 = vmul.f32 %v543_v43, %v2088_v56 }
 0x138   : > { %v1607_v36 = vpack.i.bf16 %v548_v50, %v547_v45 }
 0x13a   : > { %v459_v47 = vpop.permute.xlu1 %458  ;;  %1608 = vrot.lane.b32.xlu1 %v1607_v36, %s1775_s8 }
 0x13b   : > { %v467_v34 = vmul.f32 %v459_v47, %v2091_v57 }
 0x13d   : > { %v1612_v49 = vpack.i.bf16 %v468_v48, %v467_v34 }
 0x13e   : > { %v1518_v15 = vpop.permute.xlu0 %1517 }
 0x13f   : > { %v559_v51 = vpop.permute.xlu1 %558  ;;  %1613 = vrot.lane.b32.xlu0 %v1612_v49, %s1775_s8  ;;  %v1520_v28 = vunpack.i.h.bf16 %v1518_v15  ;;  %v1519_v19 = vunpack.i.l.bf16 %v1518_v15 }
 0x140   : > { %v567_v54 = vmul.f32 %v559_v51, %v2091_v57  ;;  %v505_v51 = vmul.f32 %v491_v52, %v1990_v26 }
 0x143   : > { %v563_v53 = vpop.permute.xlu1 %562 }
 0x144   : > { %v568_v59 = vmul.f32 %v563_v53, %v2088_v56 }
 0x146   : > { %v1617_v46 = vpack.i.bf16 %v568_v59, %v567_v54  ;;  %v426_v59 = vmul.f32 %v415_v12, %v1993_v27 }
 0x148   : > { %v483_v60 = vpop.permute.xlu1 %482  ;;  %1618 = vrot.lane.b32.xlu1 %v1617_v46, %s1777_s10 }
 0x149   : > { %v488_v13 = vmul.f32 %v483_v60, %v2088_v56 }
 0x14b   : > { %v1622_v61 = vpack.i.bf16 %v488_v13, %v487_v42 }
 0x14d   : > { %1623 = vrot.lane.b32.xlu0 %v1622_v61, %s1777_s10  ;;  %v331_v63 = vpop.permute.xlu1 %330 }
 0x14e   : > { %v345_v22 = vmul.f32 %v331_v63, %v1990_v26 }
 0x14f   : > { %v2157_v16 = vpop.permute.xlu0 %422 }
 0x152   : > { %v248_v0 = vpop.permute.xlu1 %247 }
 0x153   : > { %v1534_v4 = vpop.permute.xlu0 %1533  ;;  %v265_v31 = vmul.f32 %v248_v0, %v1990_v26 }
 0x154   : > { %v1535_v46 = vunpack.i.l.bf16 %v1534_v4  ;;  %v1536_v1 = vunpack.i.h.bf16 %v1534_v4 }
 0x156   : > { %v253_v55 = vpop.permute.xlu1 %252 }
 0x157   : > { %v266_v44 = vmul.f32 %v253_v55, %v1993_v27 }
 0x15b   : > { %v495_v2 = vpop.permute.xlu1 %494  ;;  %v1544_v37 = vpop.permute.xlu0 %1543 }
 0x15c   : > { %v506_v13 = vmul.f32 %v495_v2, %v1993_v27  ;;  %v1546_v61 = vunpack.i.h.bf16 %v1544_v37  ;;  %v1545_v52 = vunpack.i.l.bf16 %v1544_v37 }
 0x160   : > { %v411_v5 = vpop.permute.xlu1 %410 }
 0x161   : > { %v425_v63 = vmul.f32 %v411_v5, %v1990_v26  ;;  %v800_v26 = vsel %vm761_vm0, %v505_v51, %v1535_v46 }
 0x163   : > { %v788_v27 = vsel %vm761_vm0, %v425_v63, %v1545_v52 }
 0x165   : > { %v2147_v7 = vpop.permute.xlu1 %338 }
 0x169   : > { %v2149_v8 = vpop.permute.xlu1 %342 }
 0x16b   : > { %v1554_v41 = vpop.permute.xlu0 %1553 }
 0x16c   : > { %v1555_v15 = vunpack.i.l.bf16 %v1554_v41 }
 0x16e   : > { %v2153_v11 = vpop.permute.xlu1 %262  ;;  %v792_v5 = vsel %vm766_vm1, %v788_v27, %v1555_v15  ;;  %v507_v27 = vmul.f32 %v2151_v10, %v2091_v57 }
 0x172   : > { %v1506_v9 = vpop.permute.xlu1 %1505 }
 0x173   : > { %v1508_v20 = vunpack.i.h.bf16 %v1506_v9  ;;  %v1507_v21 = vunpack.i.l.bf16 %v1506_v9  ;;  %v1556_v9 = vunpack.i.h.bf16 %v1554_v41  ;;  %v347_v41 = vmul.f32 %v2147_v7, %v2091_v57 }
 0x174   : > { %v1564_v58 = vpop.permute.xlu0 %1563 }
 0x175   : > { %v776_v23 = vsel %vm761_vm0, %v345_v22, %v1507_v21  ;;  %v777_v25 = vsel %vm761_vm0, %v346_v18, %v1508_v20  ;;  %v1565_v18 = vunpack.i.l.bf16 %v1564_v58  ;;  %v801_v21 = vsel %vm761_vm0, %v506_v13, %v1536_v1 }
 0x176   : > { %v2155_v14 = vpop.permute.xlu1 %502  ;;  %v780_v40 = vsel %vm766_vm1, %v776_v23, %v1519_v19  ;;  %v781_v6 = vsel %vm766_vm1, %v777_v25, %v1520_v28 }
 0x177   : > { %v796_v28 = vsel %vm771_vm2, %v792_v5, %v1565_v18 }
 0x17a   : > { %v1513_v62 = vpop.permute.xlu1 %1512 }
 0x17b   : > { %v1515_v29 = vunpack.i.h.bf16 %v1513_v62  ;;  %v1514_v30 = vunpack.i.l.bf16 %v1513_v62  ;;  %v1566_v62 = vunpack.i.h.bf16 %v1564_v58 }
 0x17d   : > { %v763_v47 = vsel %vm761_vm0, %v266_v44, %v1515_v29  ;;  %v762_v48 = vsel %vm761_vm0, %v265_v31, %v1514_v30 }
 0x17e   : > { %v2159_v17 = vpop.permute.xlu1 %418 }
 0x182   : > { %v1524_v24 = vpop.permute.xlu1 %1523 }
 0x183   : > { %v1526_v38 = vunpack.i.h.bf16 %v1524_v24  ;;  %v1525_v39 = vunpack.i.l.bf16 %v1524_v24  ;;  %v789_v24 = vsel %vm761_vm0, %v426_v59, %v1546_v61 }
 0x184   : > { %v793_v4 = vsel %vm766_vm1, %v789_v24, %v1556_v9 }
 0x185   : > { %v768_v53 = vsel %vm766_vm1, %v763_v47, %v1526_v38  ;;  %v767_v54 = vsel %vm766_vm1, %v762_v48, %v1525_v39  ;;  %v797_v19 = vsel %vm771_vm2, %v793_v4, %v1566_v62  ;;  %v1574_v38 = vpop.permute.xlu0 %1573 }
 0x186   : > { %v1529_v33 = vpop.permute.xlu1 %1528  ;;  %v1576_v47 = vunpack.i.h.bf16 %v1574_v38  ;;  %v1575_v48 = vunpack.i.l.bf16 %v1574_v38 }
 0x187   : > { %v1531_v32 = vunpack.i.h.bf16 %v1529_v33  ;;  %v1530_v35 = vunpack.i.l.bf16 %v1529_v33 }
 0x189   : > { %v784_v43 = vsel %vm771_vm2, %v780_v40, %v1530_v35  ;;  %v785_v45 = vsel %vm771_vm2, %v781_v6, %v1531_v32  ;;  %v814_v35 = vpack.c.bf16 %v797_v19, %v796_v28 }
 0x18a   : > { %v1539_v50 = vpop.permute.xlu1 %1538  ;;  %v813_v36 = vpack.c.bf16 %v785_v45, %v784_v43  ;;  %v348_v43 = vmul.f32 %v2149_v8, %v2088_v56 }
 0x18b   : > { %v1541_v34 = vunpack.i.h.bf16 %v1539_v50  ;;  %v1540_v49 = vunpack.i.l.bf16 %v1539_v50  ;;  %v1584_v45 = vpop.permute.xlu0 %1583  ;;  %v267_v50 = vmul.f32 %v2145_v3, %v2091_v57 }
 0x18c   : > { %1115 = vmatprep.mubr.bf16.mxu0 %v813_v36  ;;  %v268_v36 = vmul.f32 %v2153_v11, %v2088_v56  ;;  %v1586_v7 = vunpack.i.h.bf16 %v1584_v45  ;;  %v1585_v59 = vunpack.i.l.bf16 %v1584_v45 }
 0x18d   : > { %v772_v60 = vsel %vm771_vm2, %v767_v54, %v1540_v49  ;;  %v773_v42 = vsel %vm771_vm2, %v768_v53, %v1541_v34  ;;  %v764_v13 = vsel %vm761_vm0, %v267_v50, %v1575_v48 }
 0x18e   : > { %v1549_v0 = vpop.permute.xlu1 %1548  ;;  %v812_v55 = vpack.c.bf16 %v773_v42, %v772_v60  ;;  %v765_v42 = vsel %vm761_vm0, %v268_v36, %v1576_v47 }
 0x18f   : > { %v1551_v12 = vunpack.i.h.bf16 %v1549_v0  ;;  %v1550_v20 = vunpack.i.l.bf16 %v1549_v0  ;;  %v769_v0 = vsel %vm766_vm1, %v764_v13, %v1585_v59 }
 0x190   : > { %1116 = vmatmul.mubr.bf16.vlgmr.msra.gmra.mrb[0].mxu0 %v812_v55  ;;  %v770_v55 = vsel %vm766_vm1, %v765_v42, %v1586_v7 }
 0x191   : > { %v804_v23 = vsel %vm766_vm1, %v800_v26, %v1550_v20  ;;  %v805_v25 = vsel %vm766_vm1, %v801_v21, %v1551_v12 }
 0x192   : > { %v1559_v2 = vpop.permute.xlu1 %1558 }
 0x193   : > { %v1561_v22 = vunpack.i.h.bf16 %v1559_v2  ;;  %v1560_v37 = vunpack.i.l.bf16 %v1559_v2  ;;  %v508_v2 = vmul.f32 %v2155_v14, %v2088_v56 }
 0x195   : > { %v808_v33 = vsel %vm771_vm2, %v804_v23, %v1560_v37  ;;  %v809_v29 = vsel %vm771_vm2, %v805_v25, %v1561_v22 }
 0x196   : > { %v1569_v30 = vpop.permute.xlu1 %1568  ;;  %v815_v32 = vpack.c.bf16 %v809_v29, %v808_v33 }
 0x197   : > { %v1571_v40 = vunpack.i.h.bf16 %v1569_v30  ;;  %v1570_v6 = vunpack.i.l.bf16 %v1569_v30 }
 0x198   : > { %1164 = vmatprep.mubr.bf16.mxu1 %v815_v32  ;;  %v428_v32 = vmul.f32 %v2157_v16, %v2088_v56 }
 0x199   : > { %1165 = vmatmul.mubr.bf16.vlgmr.msra.gmra.mrb[0].mxu1 %v814_v35  ;;  %v779_v49 = vsel %vm761_vm0, %v348_v43, %v1571_v40  ;;  %v778_v51 = vsel %vm761_vm0, %v347_v41, %v1570_v6  ;;  %v1594_v15 = vpop.permute.xlu0 %1593  ;;  %v427_v35 = vmul.f32 %v2159_v17, %v2091_v57 }
 0x19a   : > { %v1579_v39 = vpop.permute.xlu1 %1578  ;;  %v1596_v12 = vunpack.i.h.bf16 %v1594_v15  ;;  %v1595_v20 = vunpack.i.l.bf16 %v1594_v15 }
 0x19b   : > { %v1581_v31 = vunpack.i.h.bf16 %v1579_v39  ;;  %v1580_v44 = vunpack.i.l.bf16 %v1579_v39 }
 0x19c   : > { %v803_v4 = vsel %vm761_vm0, %v508_v2, %v1596_v12  ;;  %v802_v22 = vsel %vm761_vm0, %v507_v27, %v1595_v20 }
 0x19d   : > { %v782_v8 = vsel %vm766_vm1, %v778_v51, %v1580_v44  ;;  %v783_v46 = vsel %vm766_vm1, %v779_v49, %v1581_v31 }
 0x19e   : > { %v1589_v34 = vpop.permute.xlu1 %1588 }
 0x19f   : > { %v1591_v53 = vunpack.i.h.bf16 %v1589_v34  ;;  %v1590_v54 = vunpack.i.l.bf16 %v1589_v34  ;;  %v1296_v34 = vld [vmem:[%s2293_s3] ss:$0 sm:$0xff] }
 0x1a1   : > { %v786_v3 = vsel %vm771_vm2, %v782_v8, %v1590_v54  ;;  %v787_v58 = vsel %vm771_vm2, %v783_v46, %v1591_v53 }
 0x1a2   : > { %v1599_v11 = vpop.permute.xlu1 %1598  ;;  %v817_v60 = vpack.c.bf16 %v787_v58, %v786_v3 }
 0x1a3   : > { %v1601_v61 = vunpack.i.h.bf16 %v1599_v11  ;;  %v1600_v63 = vunpack.i.l.bf16 %v1599_v11 }
 0x1a4   : > { %1123 = vmatprep.mubr.bf16.mxu0 %v817_v60 }
 0x1a5   : > { %v774_v1 = vsel %vm771_vm2, %v769_v0, %v1600_v63  ;;  %v775_v52 = vsel %vm771_vm2, %v770_v55, %v1601_v61 }
 0x1a6   : > { %v816_v9 = vpack.c.bf16 %v775_v52, %v774_v1 }
 0x1a7   : > { %v1604_v18 = vpop.permute.xlu0 %1603 }
 0x1a8   : > { %1124 = vmatmul.mubr.bf16.gmra.mrb[4].mxu0 %v816_v9  ;;  %v1606_v25 = vunpack.i.h.bf16 %v1604_v18  ;;  %v1605_v28 = vunpack.i.l.bf16 %v1604_v18 }
 0x1aa   : > { %v791_v40 = vsel %vm761_vm0, %v428_v32, %v1606_v25  ;;  %v790_v6 = vsel %vm761_vm0, %v427_v35, %v1605_v28 }
 0x1ac   : > { %v1609_v62 = vpop.permute.xlu1 %1608 }
 0x1ad   : > { %v1611_v21 = vunpack.i.h.bf16 %v1609_v62  ;;  %v1610_v24 = vunpack.i.l.bf16 %v1609_v62 }
 0x1af   : > { %v806_v19 = vsel %vm766_vm1, %v802_v22, %v1610_v24  ;;  %v807_v33 = vsel %vm766_vm1, %v803_v4, %v1611_v21 }
 0x1b1   : > { %v1614_v26 = vpop.permute.xlu0 %1613 }
 0x1b2   : > { %v1616_v29 = vunpack.i.h.bf16 %v1614_v26  ;;  %v1615_v30 = vunpack.i.l.bf16 %v1614_v26 }
 0x1b4   : > { %v794_v41 = vsel %vm766_vm1, %v790_v6, %v1615_v30  ;;  %v795_v43 = vsel %vm766_vm1, %v791_v40, %v1616_v29 }
 0x1ba   : > { %v1619_v5 = vpop.permute.xlu1 %1618 }
 0x1bb   : > { %v1621_v37 = vunpack.i.h.bf16 %v1619_v5  ;;  %v1620_v23 = vunpack.i.l.bf16 %v1619_v5 }
 0x1bd   : > { %v810_v10 = vsel %vm771_vm2, %v806_v19, %v1620_v23  ;;  %v811_v14 = vsel %vm771_vm2, %v807_v33, %v1621_v37 }
 0x1be   : > { %v819_v38 = vpack.c.bf16 %v811_v14, %v810_v10 }
 0x1bf   : > { %v1624_v39 = vpop.permute.xlu0 %1623 }
 0x1c0   : > { %v1626_v31 = vunpack.i.h.bf16 %v1624_v39  ;;  %v1625_v44 = vunpack.i.l.bf16 %v1624_v39  ;;  %1172 = vmatprep.mubr.bf16.mxu1 %v819_v38 }
 0x1c2   : > { %v798_v56 = vsel %vm771_vm2, %v794_v41, %v1625_v44  ;;  %v799_v16 = vsel %vm771_vm2, %v795_v43, %v1626_v31 }
 0x1c3   : > { %v818_v57 = vpack.c.bf16 %v799_v16, %v798_v56 }
 0x1c5   : > { %1173 = vmatmul.mubr.bf16.gmra.mrb[4].mxu1 %v818_v57 }
 0x263   : > { %v1351_v17 = vpop.f32.mrb[0].mxu0 }
 0x264   : > { %v1352_v45 = vpop.f32.mrb[1].mxu0 }
 0x265   : > { %v1353_v50 = vadd.f32 %v1352_v45, %v1351_v17  ;;  %v1354_v36 = vpop.f32.mrb[2].mxu0 }
 0x266   : > { %v1355_v47 = vpop.f32.mrb[3].mxu0 }
 0x267   : > { %v1356_v48 = vadd.f32 %v1355_v47, %v1354_v36  ;;  %v1118_v53 = vadd.f32 %v1353_v50, %v1296_v34 }
 0x269   : > { %v1121_v8 = vadd.f32 %v1356_v48, %v1296_v34 }
 0x26c   : > { %v1379_v49 = vpop.f32.mrb[0].mxu1 }
 0x26d   : > { %v1380_v51 = vpop.f32.mrb[1].mxu1 }
 0x26e   : > { %v1381_v54 = vadd.f32 %v1380_v51, %v1379_v49  ;;  %v1382_v7 = vpop.f32.mrb[2].mxu1 }
 0x26f   : > { %v1383_v59 = vpop.f32.mrb[3].mxu1 }
 0x270   : > { %v1167_v46 = vadd.f32 %v1381_v54, %v1118_v53  ;;  %v1384_v3 = vadd.f32 %v1383_v59, %v1382_v7 }
 0x272   : > { %1181 = vst [vmem:[%s222_s20] sm:$0xff] %v1167_v46  ;;  %v1170_v58 = vadd.f32 %v1384_v3, %v1121_v8 }
 0x274   : > { %1182 = vst [vmem:[%s222_s20 + $0x8] sm:$0xff] %v1170_v58 }
 0x27b   : > { %v1357_v11 = vpop.f32.mrb[4].mxu0 }
 0x27c   : > { %v1358_v60 = vpop.f32.mrb[5].mxu0 }
 0x27d   : > { %v1359_v42 = vadd.f32 %v1358_v60, %v1357_v11  ;;  %v1360_v13 = vpop.f32.mrb[6].mxu0 }
 0x27e   : > { %v1361_v61 = vpop.f32.mrb[7].mxu0 }
 0x27f   : > { %v1362_v63 = vadd.f32 %v1361_v61, %v1360_v13  ;;  %v1126_v1 = vadd.f32 %v1359_v42, %v1296_v34 }
 0x281   : > { %v1129_v62 = vadd.f32 %v1362_v63, %v1296_v34 }
 0x298   : > { %v1385_v0 = vpop.f32.mrb[4].mxu1 }
 0x299   : > { %v1386_v55 = vpop.f32.mrb[5].mxu1 }
 0x29a   : > { %v1387_v52 = vadd.f32 %v1386_v55, %v1385_v0  ;;  %v1388_v9 = vpop.f32.mrb[6].mxu1 }
 0x29b   : > { %v1389_v15 = vpop.f32.mrb[7].mxu1 }
 0x29c   : > { %v1175_v18 = vadd.f32 %v1387_v52, %v1126_v1  ;;  %v1390_v12 = vadd.f32 %v1389_v15, %v1388_v9 }
 0x29e   : > { %1183 = vst [vmem:[%s222_s20 + $0x10] sm:$0xff] %v1175_v18  ;;  %v1178_v20 = vadd.f32 %v1390_v12, %v1129_v62 }
 0x2a0   : > { %1184 = vst [vmem:[%s222_s20 + $0x18] sm:$0xff] %v1178_v20 }
 0x2a1   : > { %1701 = shalt.err (!%p1698_p7)
}
 0x2a2   : > { %s1702_s8 = scalar_lea.hbm %s2245_s29, 512  ;;  %s1706_s11 = scalar_lea.hbm %s2294_s4, 1024 }
 0x2a3   : > { %p1703_p8 = scmp.ne.s32.totalorder %s2245_s29, %s1702_s8  ;;  %p1707_p1 = scmp.lt.u32.totalorder %s2245_s29, %s2294_s4 }
 0x2a4   : > { %p1708_p0 = scmp.lt.u32.totalorder %s1706_s11, %s1702_s8  ;;  %p1710_p6 = scmp.lt.u32.totalorder %s1702_s8, %s2245_s29 }
 0x2a5   : > { %p1704_p11 = pnand %p1703_p8, %p2305_p9 }
 0x2a6   : > { %p1709_p5 = por %p1708_p0, %p1707_p1 }
 0x2a7   : > { %p1705_p13 = pneg %p1704_p11 }
 0x2a8   : > { %p1711_p10 = por %p1710_p6, %p1709_p5 }
 0x2aa   : > { %p1712_p12 = pnand %p1711_p10, %p1705_p13 }
 0x2ac   : > { %1715 = shalt.err (!%p1712_p12)
}
 0x2ad   : > { %s1779_s14 = smov 128   ;;  %s1780_s20 = smov 8  }
 0x2ae   : > { %1395 = dma.vmem_to_hbm [thread:$0]  (%p2305_p9), %s2240_s22, 512, %s2245_s29, %s2249_s30, %s1779_s14, %s1779_s14, %s1780_s20  }
 0x2af PF: > { %p1407_p2 = scmp.ge.s32.totalorder %s1754_s18, 2  ;;  %s1214_s23 = sand.u32 1, %s1742_s15  }
 0x2b0   : > { %p2306_p3 = scmp.ne.s32.totalorder %s2299_s26, 0  ;;  %s1215_s27 = scalar_lea.sflag [#allocation4], %s1214_s23 }
 0x2b2   : > { %p1402_p4 = pnand %p1407_p2, %p2306_p3 }
 0x2b4   : > { %1737 = dma.done.wait (!%p1402_p4), %s1215_s27, 512  }
 0x2b5   : > { %1739 = vsyncadd (!%p1402_p4), %s1215_s27, 4294966784  ;;  %p15_p7 = scmp.ge.s32.totalorder %s1831_s21, 4   ;;  %s2307_s15 = smov %s1746_s16 }
 0x2b6   : > { %s2308_s16 = smov %s1750_s17  ;;  %s2309_s17 = smov %s1842_s24 }
 0x2b7   : > { %s2310_s18 = smov %s1831_s21  ;;  %17 = sbr.rel (!%p15_p7) target bundleno = 4 (0x4), region = 79 }
 0x2be   :  { %1220 = vsyncpa [#allocation3], 1 }
 0x2bf   :  { %1222 = vsyncpa [#allocation3 + $0x1], 1 }
 0x2c0   :  { %1223 = vsyncpa [#allocation4], 1 }
 0x2c1   :  { %1225 = vsyncpa [#allocation4 + $0x1], 1 }

</bundles_post_ra>
